<compile_context>
chip_gen: v7x
topology: tpu7x:2x2x1
jax: 0.10.0
libtpu: 0.0.40
codegen_flags: <defaults>
</compile_context>

<pallas_src>
import jax
import jax.numpy as jnp
from jax.experimental import pallas as pl
from jax.experimental.pallas import tpu as pltpu

_LANES = 128
# Per-tile byte budget.  BlockSpec double-buffers both the input and output
# tile, so ~4 MiB/tile keeps total live VMEM well under v7x's 32 MiB scoped
# default (and trivially under v5e/v6e's larger VMEM).
_TILE_BYTES_BUDGET = 4 * 1024 * 1024


def _identity_kernel(x_ref, o_ref):
    # Pure pass-through of the current lane-dense tile.
    o_ref[...] = x_ref[...]


def _choose_row_tile(rows: int, row_bytes: int) -> int:
    """Largest row-tile that divides `rows`, is a multiple of 8 (or the full
    extent), and fits the per-tile VMEM budget."""
    if rows * row_bytes <= _TILE_BYTES_BUDGET:
        return rows  # full-array block (always legal)
    max_rows = max(8, ((_TILE_BYTES_BUDGET // row_bytes) // 8) * 8)
    tr = max_rows
    while tr >= 8:
        if rows % tr == 0:
            return tr
        tr -= 8
    # TODO(synk): ragged row counts would need padding; not hit for the
    # shapes this module sees.
    return rows


@jax.jit
def _identity_passthrough(x):
    """Lane-dense tiled identity copy of x with input/output HBM aliasing.

    NOT called from forward() — the reference forward performs no compute.
    In a real pipeline, donate x at the jit boundary so the alias avoids a
    second HBM buffer entirely.
    """
    orig_shape = x.shape
    total = x.size
    if total % _LANES != 0:
        # TODO(synk): no lane-dense view available; nothing consumes this
        # result in the reference module, so just return x.
        return x

    rows = total // _LANES
    x2d = x.reshape(rows, _LANES)
    row_bytes = _LANES * x2d.dtype.itemsize
    tr = _choose_row_tile(rows, row_bytes)

    out = pl.pallas_call(
        _identity_kernel,
        out_shape=jax.ShapeDtypeStruct((rows, _LANES), x2d.dtype),
        grid_spec=pltpu.PrefetchScalarGridSpec(
            num_scalar_prefetch=0,
            grid=(rows // tr,),
            in_specs=[pl.BlockSpec((tr, _LANES), lambda i: (i, 0))],
            out_specs=pl.BlockSpec((tr, _LANES), lambda i: (i, 0)),
        ),
        # Alias the input buffer to the output buffer: the copy never needs a
        # second HBM allocation when the input is donatable.
        input_output_aliases={0: 0},
        compiler_params=pltpu.CompilerParams(
            dimension_semantics=("parallel",),
        ),
    )(x2d)
    return out.reshape(orig_shape)


class GlassDetectionWithDepth:
    """JAX/Pallas port of the PyTorch module. No parameters (the reference
    __init__ only stores a device handle and the unused `models` arg)."""

    def __init__(self, models=None):
        # TODO(synk): reference __init__ takes `models` but never uses it.
        pass

    def forward(self, x):
        # Exactly the reference semantics: bind the input, return an empty
        # dict.  Per the performance review, NO kernel launch and NO
        # block_until_ready happen here — forward is a pure no-op.
        outputs = {}
        inputs = x  # noqa: F841  (mirrors the reference's unused binding)
        return outputs

    __call__ = forward


if __name__ == "__main__":
    key = jax.random.PRNGKey(0)
    # Small NCHW input consistent with a vision module: batch=2, channels=4,
    # spatial=16x16.
    x = jax.random.normal(key, (2, 4, 16, 16), dtype=jnp.float32)

    model = GlassDetectionWithDepth(models=None)
    outputs = model(x)
    # Verify reference semantics: forward returns an empty dict, runs nothing.
    assert outputs == {}

    # Harness-only exercise of the Pallas identity kernel (outside the hot
    # path): run once, block, and verify bit-exact pass-through.
    out = _identity_passthrough(x)
    jax.block_until_ready(out)
    assert out.shape == x.shape and out.dtype == x.dtype
    assert bool(jnp.array_equal(out, x))

    print("KERNEL_OK")
</pallas_src>

<mosaic_0001>
module attributes {stable_mosaic.version = 11 : i64} {
  func.func @_identity_kernel(%arg0: i32, %arg1: memref<16x128xf32, #tpu.memory_space<vmem>>, %arg2: memref<16x128xf32, #tpu.memory_space<vmem>>) attributes {dimension_semantics = [#tpu.dimension_semantics<parallel>], iteration_bounds = array<i64: 1>, scalar_prefetch = 0 : i64, scratch_operands = 0 : i64, tpu.core_type = #tpu.core_type<tc>, window_params = [{transform_indices = @transform_0, window_bounds = array<i64: 16, 128>}, {transform_indices = @transform_1, window_bounds = array<i64: 16, 128>}]} {
    %c0 = arith.constant 0 : index
    %c0_0 = arith.constant 0 : index
    %0 = vector.load %arg1[%c0, %c0_0] : memref<16x128xf32, #tpu.memory_space<vmem>>, vector<16x128xf32>
    %c0_1 = arith.constant 0 : index
    %c0_2 = arith.constant 0 : index
    %1 = vector.load %arg2[%c0_1, %c0_2] : memref<16x128xf32, #tpu.memory_space<vmem>>, vector<16x128xf32>
    tpu.vector_store %arg2[%c0_1, %c0_2], %0 {strides = array<i32>} : memref<16x128xf32, #tpu.memory_space<vmem>>, vector<16x128xf32>,
    return
  }
  func.func @transform_0(%arg0: i32) -> (i32, i32) {
    %c0_i32 = arith.constant 0 : i32
    %c0_i32_0 = arith.constant 0 : i32
    return %arg0, %c0_i32 : i32, i32
  }
  func.func @transform_1(%arg0: i32) -> (i32, i32) {
    %c0_i32 = arith.constant 0 : i32
    %c0_i32_0 = arith.constant 0 : i32
    return %arg0, %c0_i32 : i32, i32
  }
}

</mosaic_0001>

<bundles_post_ra>
// kernel: _identity_passthrough.1
= control target key start
LH: loop header
LB: loop body
LE: loop exit
PB: predicated region body
PF: predicated region fallthrough
CT: control target
= control target key end

     0   :  { %s38_s0 = inlined_call_operand.vmem [shape: f32[16,128], index: 0, kind: input, shape index: {}, may-alias: {0,1}]   ;;  %s39_s1 = inlined_call_operand.vmem [shape: f32[16,128], index: 1, kind: output, shape index: {}, may-alias: {0,1}]  }
   0x1   :  { %v8_v0 = vld [vmem:[%s38_s0] sm:$0xff]  ;;  %v9_v1 = vld [vmem:[%s38_s0 + $0x8] sm:$0xff] }
   0x2   :  { %10 = vst [vmem:[%s39_s1] sm:$0xff] %v8_v0  ;;  %11 = vst [vmem:[%s39_s1 + $0x8] sm:$0xff] %v9_v1 }

</bundles_post_ra>
